<compile_context>
chip_gen: v7x
topology: tpu7x:2x2x1
jax: 0.10.0
libtpu: 0.0.40
codegen_flags: <defaults>
</compile_context>

<pallas_src>
import itertools
from functools import lru_cache, partial

import jax
import jax.numpy as jnp
from jax import lax
from jax.experimental import pallas as pl
from jax.experimental.pallas import tpu as pltpu


def _ceil_to(x, m):
    return ((x + m - 1) // m) * m


def _cdiv(a, b):
    return -(-a // b)


def _cp(c):
    """Channel count padded onto the 128-lane axis."""
    return _ceil_to(c, 128)


def _tpu_config():
    """Generation-aware VMEM budget / tile caps (conservative fallback == v7x settings)."""
    try:
        vmem = int(pltpu.get_tpu_info().vmem_capacity_bytes)
    except Exception:
        vmem = 64 * 1024 * 1024
    if vmem >= 96 * 1024 * 1024:                      # v5e / v6e: 128 MiB physical VMEM
        return dict(vmem_limit=min(100 * 1024 * 1024, vmem - 24 * 1024 * 1024),
                    gemm_tm_cap=1024,
                    dw_budget=24 * 1024 * 1024)
    # v7x: 64 MiB per TensorCore and both cores active once grids are megacore-parallel
    return dict(vmem_limit=40 * 1024 * 1024, gemm_tm_cap=512, dw_budget=10 * 1024 * 1024)


_CFG = _tpu_config()


def _pick_tm(m, cap):
    return m if m <= cap else cap


# ----------------------------------------------------------------------------- #
# GEMM kernel: 1x1 convs / classifier.
#   bf16 x bf16 -> f32 accumulate, folded-BN scale/bias + activation in f32,
#   optional fused SE channel-scale (bf16, on the input side) and residual add.
# ----------------------------------------------------------------------------- #
def _gemm_kernel(x_ref, w_ref, s_ref, b_ref, *rest, act, has_se, has_res):
    rest = list(rest)
    se_ref = rest.pop(0) if has_se else None
    r_ref = rest.pop(0) if has_res else None
    o_ref = rest.pop(0)

    x = x_ref[0]                                               # (tm, K) bf16
    if has_se:                                                 # per-image SE scale, bf16 on-chip
        x = x * se_ref[0]
    acc = jnp.dot(x, w_ref[...], preferred_element_type=jnp.float32)   # MXU bf16 matmul
    acc = acc * s_ref[...] + b_ref[...]                        # folded BN (or bias, scale==1)
    if act == "silu":
        acc = acc * jax.nn.sigmoid(acc)
    elif act == "sigmoid":
        acc = jax.nn.sigmoid(acc)
    if has_res:                                                # fused residual add
        acc = acc + r_ref[0].astype(jnp.float32)
    o_ref[...] = acc[None].astype(o_ref.dtype)


@lru_cache(maxsize=None)
def _gemm_call(n, m, kp, np_, tm, act, has_se, has_res, out_dtype, vmem_limit):
    nblk = _cdiv(m, tm)                                        # partial last block is fine
    in_specs = [
        pl.BlockSpec((1, tm, kp), lambda b, i: (b, i, 0)),
        pl.BlockSpec((kp, np_), lambda b, i: (0, 0)),
        pl.BlockSpec((1, np_), lambda b, i: (0, 0)),
        pl.BlockSpec((1, np_), lambda b, i: (0, 0)),
    ]
    if has_se:
        in_specs.append(pl.BlockSpec((1, 1, kp), lambda b, i: (b, 0, 0)))
    if has_res:
        in_specs.append(pl.BlockSpec((1, tm, np_), lambda b, i: (b, i, 0)))
    fn = pl.pallas_call(
        partial(_gemm_kernel, act=act, has_se=has_se, has_res=has_res),
        out_shape=jax.ShapeDtypeStruct((n, m, np_), jnp.dtype(out_dtype)),
        grid=(n, nblk),
        in_specs=in_specs,
        out_specs=pl.BlockSpec((1, tm, np_), lambda b, i: (b, i, 0)),
        compiler_params=pltpu.CompilerParams(
            dimension_semantics=("parallel", "parallel"),
            vmem_limit_bytes=vmem_limit),
    )
    return jax.jit(fn)


def gemm(x, w, scale, bias, act="none", se=None, res=None, out_dtype=jnp.bfloat16):
    """x:(N,M,Kp) @ w:(Kp,Np) with fused scale/bias/activation (+ optional SE scale & residual)."""
    n, m, kp = x.shape
    np_ = w.shape[1]
    tm = _pick_tm(m, _CFG["gemm_tm_cap"])
    ops = [x, w, scale, bias]
    if se is not None:
        ops.append(se)
    if res is not None:
        ops.append(res)
    fn = _gemm_call(n, m, kp, np_, tm, act, se is not None, res is not None,
                    jnp.dtype(out_dtype).name, _CFG["vmem_limit"])
    return fn(*ops)


# ----------------------------------------------------------------------------- #
# Head 1x1 conv + BN + SiLU with the global average pool fused (the (N,HW,1792)
# feature map is never written to HBM).  Output block is revisited across the
# row-block axis -> accumulator pattern ("arbitrary" reduction axis).  The partial
# last row block is masked with a select (stale OOB rows never reach the pool).
# ----------------------------------------------------------------------------- #
def _gemm_pool_kernel(x_ref, w_ref, s_ref, b_ref, o_ref, *, inv_hw, m_valid, tm):
    acc = jnp.dot(x_ref[0], w_ref[...], preferred_element_type=jnp.float32)
    acc = acc * s_ref[...] + b_ref[...]
    acc = acc * jax.nn.sigmoid(acc)                            # SiLU

    rows = pl.program_id(1) * tm + lax.broadcasted_iota(jnp.int32, (tm, 1), 0)
    acc = jnp.where(rows < m_valid, acc, 0.0)                  # mask partial last block

    @pl.when(pl.program_id(1) == 0)
    def _():
        o_ref[...] = jnp.zeros_like(o_ref)

    o_ref[...] += (jnp.sum(acc, axis=0) * inv_hw)[None, None, :]


@lru_cache(maxsize=None)
def _gemm_pool_call(n, m, kp, np_, tm, vmem_limit):
    nblk = _cdiv(m, tm)
    fn = pl.pallas_call(
        partial(_gemm_pool_kernel, inv_hw=1.0 / m, m_valid=m, tm=tm),
        out_shape=jax.ShapeDtypeStruct((n, 1, np_), jnp.float32),
        grid=(n, nblk),
        in_specs=[
            pl.BlockSpec((1, tm, kp), lambda b, i: (b, i, 0)),
            pl.BlockSpec((kp, np_), lambda b, i: (0, 0)),
            pl.BlockSpec((1, np_), lambda b, i: (0, 0)),
            pl.BlockSpec((1, np_), lambda b, i: (0, 0)),
        ],
        out_specs=pl.BlockSpec((1, 1, np_), lambda b, i: (b, 0, 0)),
        compiler_params=pltpu.CompilerParams(
            dimension_semantics=("parallel", "arbitrary"),
            vmem_limit_bytes=vmem_limit),
    )
    return jax.jit(fn)


def gemm_avgpool(x, w, scale, bias):
    n, m, kp = x.shape
    np_ = w.shape[1]
    tm = _pick_tm(m, _CFG["gemm_tm_cap"])
    return _gemm_pool_call(n, m, kp, np_, tm, _CFG["vmem_limit"])(x, w, scale, bias)


# ----------------------------------------------------------------------------- #
# Fused SE MLP: pooled (N, C) -> fc1 + SiLU -> fc2 + sigmoid -> (N, C) bf16.
# One pallas_call per block (was two M=1 launches); both small weights resident.
# ----------------------------------------------------------------------------- #
def _se_kernel(x_ref, w1_ref, b1_ref, w2_ref, b2_ref, o_ref):
    h = jnp.dot(x_ref[...], w1_ref[...], preferred_element_type=jnp.float32) + b1_ref[...]
    h = h * jax.nn.sigmoid(h)                                  # SiLU
    o = jnp.dot(h.astype(jnp.bfloat16), w2_ref[...],
                preferred_element_type=jnp.float32) + b2_ref[...]
    o_ref[...] = jax.nn.sigmoid(o).astype(o_ref.dtype)


@lru_cache(maxsize=None)
def _se_call(n, cp, sqp, vmem_limit):
    fn = pl.pallas_call(
        _se_kernel,
        out_shape=jax.ShapeDtypeStruct((n, cp), jnp.bfloat16),
        grid=(1,),
        in_specs=[pl.BlockSpec((n, cp), lambda i: (0, 0)),
                  pl.BlockSpec((cp, sqp), lambda i: (0, 0)),
                  pl.BlockSpec((1, sqp), lambda i: (0, 0)),
                  pl.BlockSpec((sqp, cp), lambda i: (0, 0)),
                  pl.BlockSpec((1, cp), lambda i: (0, 0))],
        out_specs=pl.BlockSpec((n, cp), lambda i: (0, 0)),
        compiler_params=pltpu.CompilerParams(
            dimension_semantics=("arbitrary",),
            vmem_limit_bytes=vmem_limit),
    )
    return jax.jit(fn)


def se_mlp(pooled, w1, b1, w2, b2):
    n, _, cp = pooled.shape
    sqp = w1.shape[1]
    x = pooled.reshape(n, cp).astype(jnp.bfloat16)
    se = _se_call(n, cp, sqp, _CFG["vmem_limit"])(x, w1, b1, w2, b2)
    return se.reshape(n, 1, cp)


# ----------------------------------------------------------------------------- #
# Depthwise kxk conv + folded BN + SiLU, SE global-average-pool fused.
# The padded feature map stays in HBM (pl.ANY); each grid step manually DMAs a
# halo'd row block (double-buffered).  kw (sublane) shifts are hoisted: at most
# stride*k shifted planes are materialized per block and the f32 accumulator is
# touched at most stride*k times.  Grid = (batch, row_block) so megacore can
# shard the batch axis; the SE pool accumulator is per-image so this is safe.
# ----------------------------------------------------------------------------- #
def _dw_kernel(w_ref, s_ref, b_ref, xq_hbm, y_ref, pool_ref, xbuf, sem,
               *, k, stride, th, d, ho, inv_hw):
    bidx = pl.program_id(0)
    i = pl.program_id(1)
    nhb = pl.num_programs(1)
    slot = i % 2
    n_planes = stride * stride
    wo = y_ref.shape[2]
    c = y_ref.shape[3]

    def _copies(blk, sl):
        # the wait descriptors are built from exactly the same slices as the starts
        return [pltpu.make_async_copy(
                    xq_hbm.at[bidx, pp, pl.ds(blk * th, th + d), :, :],
                    xbuf.at[sl, pp],
                    sem.at[sl, pp])
                for pp in range(n_planes)]

    @pl.when(i == 0)                        # prime the pipeline for this image
    def _():
        for cp_ in _copies(i, slot):
            cp_.start()

    @pl.when(i + 1 < nhb)                   # prefetch the next halo block
    def _():
        for cp_ in _copies(i + 1, 1 - slot):
            cp_.start()

    for cp_ in _copies(i, slot):            # wait for this step's block
        cp_.wait()

    acc = jnp.zeros((th, wo, c), jnp.float32)
    for pp in range(n_planes):
        a, b2 = pp // stride, pp % stride
        plane = xbuf.at[slot, pp]                                   # (th+d, wh, c) bf16 ref view
        khs = [kh for kh in range(k) if kh % stride == a]
        kws = [kw for kw in range(k) if kw % stride == b2]
        if not khs or not kws:
            continue
        for kw in kws:
            qw = kw // stride
            shifted = plane[:, pl.ds(qw, wo), :]                    # one sublane-shift load
            part = None
            for kh in khs:
                qh = kh // stride
                tap = shifted[qh:qh + th]                           # leading-axis slice: cheap
                term = (tap * w_ref[kh * k + kw, :]).astype(jnp.float32)   # bf16 mul, widen on add
                part = term if part is None else part + term
            acc = acc + part

    acc = acc * s_ref[...] + b_ref[...]
    acc = acc * jax.nn.sigmoid(acc)         # SiLU
    y_ref[...] = acc[None].astype(y_ref.dtype)

    # fused SE global average pool (per-image accumulator across row blocks)
    @pl.when(i == 0)
    def _():
        pool_ref[...] = jnp.zeros_like(pool_ref)

    rows = i * th + lax.broadcasted_iota(jnp.int32, (th, 1), 0)
    psum = jnp.where(rows < ho, jnp.sum(acc, axis=1), 0.0)          # mask rows beyond Ho
    pool_ref[...] += (jnp.sum(psum, axis=0) * inv_hw)[None, None, :]


@lru_cache(maxsize=None)
def _dw_call(n, c, k, stride, ho, wo, th, d, vmem_limit):
    n_planes = stride * stride
    wh = wo + d
    nhb = _cdiv(ho, th)
    fn = pl.pallas_call(
        partial(_dw_kernel, k=k, stride=stride, th=th, d=d, ho=ho, inv_hw=1.0 / (ho * wo)),
        out_shape=(jax.ShapeDtypeStruct((n, ho, wo, c), jnp.bfloat16),
                   jax.ShapeDtypeStruct((n, 1, c), jnp.float32)),
        grid=(n, nhb),
        in_specs=[
            pl.BlockSpec((k * k, c), lambda b, i: (0, 0)),
            pl.BlockSpec((1, c), lambda b, i: (0, 0)),
            pl.BlockSpec((1, c), lambda b, i: (0, 0)),
            pl.BlockSpec(memory_space=pl.ANY),        # feature map stays in HBM; manual halo DMA
        ],
        out_specs=(pl.BlockSpec((1, th, wo, c), lambda b, i: (b, i, 0, 0)),
                   pl.BlockSpec((1, 1, c), lambda b, i: (b, 0, 0))),
        scratch_shapes=[pltpu.VMEM((2, n_planes, th + d, wh, c), jnp.bfloat16),
                        pltpu.SemaphoreType.DMA((2, n_planes))],
        compiler_params=pltpu.CompilerParams(
            dimension_semantics=("parallel", "arbitrary"),
            vmem_limit_bytes=vmem_limit),
    )
    return jax.jit(fn)


def dwconv_silu_sepool(x, hw_shape, w, scale, bias, k, stride):
    """x: (N, H*W, C) bf16 -> (y: (N, Ho*Wo, C) bf16, pooled: (N, 1, C) f32, (Ho, Wo))."""
    h, wdim = hw_shape
    n, _, c = x.shape
    p = (k - 1) // 2
    ho = (h + 2 * p - k) // stride + 1
    wo = (wdim + 2 * p - k) // stride + 1
    d = (k - 1) // stride
    wh = wo + d
    n_planes = stride * stride

    # Row block from a VMEM budget (halo'd bf16 double buffer + f32 acc/partials + outputs),
    # then balanced via cdiv so the last block wastes at most nhb-1 rows.
    per_row = c * (4 * n_planes * wh + 18 * wo)
    th_cap = max(1, min(ho, _CFG["dw_budget"] // per_row))
    nhb = _cdiv(ho, th_cap)
    th = _cdiv(ho, nhb)
    hh_pad = nhb * th + d

    # TODO(synk): do this zero-padding + stride-parity decomposition inside the kernel
    #             (or fuse the expand GEMM) to avoid an extra HBM round trip per layer.
    xs = x.reshape(n, h, wdim, c)
    xs = jnp.pad(xs, ((0, 0), (p, hh_pad * stride - h - p), (p, wh * stride - wdim - p), (0, 0)))
    # stride-parity planes: plane[a*stride+b][i, j] = xpad[i*stride + a, j*stride + b]
    xq = xs.reshape(n, hh_pad, stride, wh, stride, c)
    xq = jnp.transpose(xq, (0, 2, 4, 1, 3, 5)).reshape(n, n_planes, hh_pad, wh, c)

    y, pooled = _dw_call(n, c, k, stride, ho, wo, th, d, _CFG["vmem_limit"])(w, scale, bias, xq)
    return y.reshape(n, ho * wo, c), pooled, (ho, wo)


# ----------------------------------------------------------------------------- #
# Stem conv (3x3 / s2, 3->48) via im2col + GEMM (K = 27, full-dim block, no 128 pad).
# TODO(synk): fuse the im2col into the GEMM (K grid axis over (kh,kw)) for full-res inputs.
# ----------------------------------------------------------------------------- #
def stem_conv(x_nhwc, w, scale, bias):
    n, h, wdim, _ = x_nhwc.shape
    k, stride, p = 3, 2, 1
    ho = (h + 2 * p - k) // stride + 1
    wo = (wdim + 2 * p - k) // stride + 1
    xp = jnp.pad(x_nhwc, ((0, 0), (p, p), (p, p), (0, 0)))
    cols = []
    for kh in range(k):
        for kw in range(k):
            cols.append(xp[:, kh:kh + (ho - 1) * stride + 1:stride,
                           kw:kw + (wo - 1) * stride + 1:stride, :])
    patches = jnp.stack(cols, axis=3).reshape(n, ho * wo, k * k * 3).astype(jnp.bfloat16)
    y = gemm(patches, w, scale, bias, act="silu")
    return y, (ho, wo)


# ----------------------------------------------------------------------------- #
# EfficientNet-B4 architecture (width_mult=1.4, depth_mult=1.8) + custom classifier.
# ----------------------------------------------------------------------------- #
STAGE_CFG = [
    # (expand_ratio, kernel, stride, in_ch, out_ch, num_layers)
    (1, 3, 1, 48, 24, 2),
    (6, 3, 2, 24, 32, 4),
    (6, 5, 2, 32, 56, 4),
    (6, 3, 2, 56, 112, 6),
    (6, 5, 1, 112, 160, 6),
    (6, 5, 2, 160, 272, 8),
    (6, 3, 1, 272, 448, 2),
]
STEM_CH, HEAD_CH, NUM_CLASSES = 48, 1792, 500


def init_params(key):
    counter = itertools.count()

    def nk():
        return jax.random.fold_in(key, next(counter))

    def dense(cin, cout, cin_p, cout_p):        # bf16 GEMM weight, zero-padded to lane multiples
        w = (cin ** -0.5) * jax.random.normal(nk(), (cin, cout), jnp.float32)
        return jnp.pad(w, ((0, cin_p - cin), (0, cout_p - cout))).astype(jnp.bfloat16)

    def bnsb(c, c_p):                           # folded BatchNorm scale / bias (eval mode)
        s = 1.0 + 0.05 * jax.random.normal(nk(), (c,), jnp.float32)
        b = 0.05 * jax.random.normal(nk(), (c,), jnp.float32)
        return (jnp.pad(s, (0, c_p - c)).reshape(1, c_p),
                jnp.pad(b, (0, c_p - c)).reshape(1, c_p))

    def bias_row(c, c_p, pad_value=0.0):
        b = 0.05 * jax.random.normal(nk(), (c,), jnp.float32)
        return jnp.pad(b, (0, c_p - c), constant_values=pad_value).reshape(1, c_p)

    params = {}
    params["stem_w"] = dense(27, STEM_CH, 27, _cp(STEM_CH))         # rows ordered (kh, kw, cin)
    params["stem_s"], params["stem_b"] = bnsb(STEM_CH, _cp(STEM_CH))

    blocks = []
    for (er, k, st, cin, cout, nl) in STAGE_CFG:
        for li in range(nl):
            ci = cin if li == 0 else cout
            s = st if li == 0 else 1
            hidden = ci * er
            sq = max(1, ci // 4)
            cip, cop, hidp, sqp = _cp(ci), _cp(cout), _cp(hidden), _cp(sq)
            p = {"cfg": (er, k, s, ci, cout)}
            if er != 1:
                p["exp_w"] = dense(ci, hidden, cip, hidp)
                p["exp_s"], p["exp_b"] = bnsb(hidden, hidp)
            dw = (1.0 / k) * jax.random.normal(nk(), (k * k, hidden), jnp.float32)
            p["dw_w"] = jnp.pad(dw, ((0, 0), (0, hidp - hidden))).astype(jnp.bfloat16)
            p["dw_s"], p["dw_b"] = bnsb(hidden, hidp)
            p["fc1_w"] = dense(hidden, sq, hidp, sqp)
            p["fc1_b"] = bias_row(sq, sqp)
            p["fc2_w"] = dense(sq, hidden, sqp, hidp)
            # padded lanes get a large negative bias so sigmoid -> 0 there (keeps SE vector
            # zero on padded channels for any future fusion that relies on it)
            p["fc2_b"] = bias_row(hidden, hidp, pad_value=-100.0)
            p["proj_w"] = dense(hidden, cout, hidp, cop)
            p["proj_s"], p["proj_b"] = bnsb(cout, cop)
            blocks.append(p)
    params["blocks"] = blocks

    params["head_w"] = dense(448, HEAD_CH, _cp(448), _cp(HEAD_CH))
    params["head_s"], params["head_b"] = bnsb(HEAD_CH, _cp(HEAD_CH))
    params["cls_w"] = dense(HEAD_CH, NUM_CLASSES, _cp(HEAD_CH), _cp(NUM_CLASSES))
    params["cls_b"] = bias_row(NUM_CLASSES, _cp(NUM_CLASSES))
    params["cls_s"] = jnp.ones((1, _cp(NUM_CLASSES)), jnp.float32)
    return params


def forward(params, x_nchw):
    x = jnp.transpose(x_nchw, (0, 2, 3, 1)).astype(jnp.float32)      # NCHW -> NHWC
    x, hw = stem_conv(x, params["stem_w"], params["stem_s"], params["stem_b"])

    for p in params["blocks"]:
        er, k, s, ci, co = p["cfg"]
        inp = x
        if er != 1:                                                   # expand 1x1 + BN + SiLU
            x = gemm(x, p["exp_w"], p["exp_s"], p["exp_b"], act="silu")
        # depthwise + BN + SiLU with the SE global average pool fused into the same kernel
        x, pooled, hw = dwconv_silu_sepool(x, hw, p["dw_w"], p["dw_s"], p["dw_b"], k, s)
        # fused SE MLP on the small (N, C) pooled vector (one launch, bf16 output)
        se = se_mlp(pooled, p["fc1_w"], p["fc1_b"], p["fc2_w"], p["fc2_b"])
        # projection 1x1 + BN with the SE channel-scale and residual add fused in the epilogue.
        # TODO(synk): StochasticDepth is identity in eval mode; plain residual add only.
        res = inp if (s == 1 and ci == co) else None
        x = gemm(x, p["proj_w"], p["proj_s"], p["proj_b"], act="none", se=se, res=res)

    # head 1x1 conv 448->1792 + BN + SiLU, global avg pool fused (map never hits HBM);
    # classifier: Dropout(p=0.3) is identity in eval; Linear(1792, 500).
    pooled = gemm_avgpool(x, params["head_w"], params["head_s"], params["head_b"])
    logits = gemm(pooled.astype(jnp.bfloat16), params["cls_w"], params["cls_s"],
                  params["cls_b"], act="none", out_dtype=jnp.float32)
    return logits[:, 0, :NUM_CLASSES]


if __name__ == "__main__":
    key = jax.random.PRNGKey(0)
    params = init_params(key)
    x = jax.random.normal(jax.random.fold_in(key, 10_000), (2, 3, 32, 32), jnp.float32)  # NCHW
    out = forward(params, x)
    out = jax.block_until_ready(out)
    assert out.shape == (2, NUM_CLASSES), out.shape
    assert bool(jnp.all(jnp.isfinite(out)))
    print("KERNEL_OK")
</pallas_src>

<mosaic_0001>
module attributes {stable_mosaic.version = 11 : i64} {
  func.func @_gemm_kernel(%arg0: i32, %arg1: i32, %arg2: memref<1x256x27xbf16, #tpu.memory_space<vmem>>, %arg3: memref<27x128xbf16, #tpu.memory_space<vmem>>, %arg4: memref<1x128xf32, #tpu.memory_space<vmem>>, %arg5: memref<1x128xf32, #tpu.memory_space<vmem>>, %arg6: memref<1x256x128xbf16, #tpu.memory_space<vmem>>) attributes {dimension_semantics = [#tpu.dimension_semantics<parallel>, #tpu.dimension_semantics<parallel>], iteration_bounds = array<i64: 2, 1>, scalar_prefetch = 0 : i64, scratch_operands = 0 : i64, tpu.core_type = #tpu.core_type<tc>, window_params = [{transform_indices = @transform_0, window_bounds = array<i64: 1, 256, 27>}, {pipeline_mode = #tpu.pipeline_mode<synchronous>, transform_indices = @transform_1, window_bounds = array<i64: 27, 128>}, {pipeline_mode = #tpu.pipeline_mode<synchronous>, transform_indices = @transform_2, window_bounds = array<i64: 1, 128>}, {pipeline_mode = #tpu.pipeline_mode<synchronous>, transform_indices = @transform_3, window_bounds = array<i64: 1, 128>}, {transform_indices = @transform_4, window_bounds = array<i64: 1, 256, 128>}]} {
    %c0 = arith.constant 0 : index
    %c0_0 = arith.constant 0 : index
    %c0_1 = arith.constant 0 : index
    %0 = vector.load %arg2[%c0, %c0_0, %c0_1] : memref<1x256x27xbf16, #tpu.memory_space<vmem>>, vector<1x256x27xbf16>
    %1 = vector.shape_cast %0 : vector<1x256x27xbf16> to vector<256x27xbf16>
    %c0_2 = arith.constant 0 : index
    %c0_3 = arith.constant 0 : index
    %2 = vector.load %arg3[%c0_2, %c0_3] : memref<27x128xbf16, #tpu.memory_space<vmem>>, vector<27x128xbf16>
    %cst = arith.constant dense<0.000000e+00> : vector<256x128xf32>
    %3 = tpu.matmul %1, %2, %cst {dimension_numbers = #tpu.dot_dimension_numbers<[1], [0], [0], [1], [0, 0, 1, 1], [], []>} : vector<256x27xbf16>, vector<27x128xbf16>, vector<256x128xf32> -> vector<256x128xf32>
    %c0_4 = arith.constant 0 : index
    %c0_5 = arith.constant 0 : index
    %4 = vector.load %arg4[%c0_4, %c0_5] : memref<1x128xf32, #tpu.memory_space<vmem>>, vector<1x128xf32>
    %5 = vector.broadcast %4 : vector<1x128xf32> to vector<256x128xf32>
    %6 = arith.mulf %3, %5 : vector<256x128xf32>
    %c0_6 = arith.constant 0 : index
    %c0_7 = arith.constant 0 : index
    %7 = vector.load %arg5[%c0_6, %c0_7] : memref<1x128xf32, #tpu.memory_space<vmem>>, vector<1x128xf32>
    %8 = vector.broadcast %7 : vector<1x128xf32> to vector<256x128xf32>
    %9 = arith.addf %6, %8 : vector<256x128xf32>
    %10 = arith.negf %9 : vector<256x128xf32>
    %11 = math.exp %10 : vector<256x128xf32>
    %cst_8 = arith.constant 1.000000e+00 : f32
    %12 = vector.broadcast %cst_8 : f32 to vector<256x128xf32>
    %13 = arith.addf %12, %11 : vector<256x128xf32>
    %14 = arith.divf %12, %13 : vector<256x128xf32>
    %15 = arith.mulf %9, %14 : vector<256x128xf32>
    %16 = vector.shape_cast %15 : vector<256x128xf32> to vector<1x256x128xf32>
    %17 = arith.truncf %16 : vector<1x256x128xf32> to vector<1x256x128xbf16>
    %c0_9 = arith.constant 0 : index
    %c0_10 = arith.constant 0 : index
    %c0_11 = arith.constant 0 : index
    %18 = vector.load %arg6[%c0_9, %c0_10, %c0_11] : memref<1x256x128xbf16, #tpu.memory_space<vmem>>, vector<1x256x128xbf16>
    tpu.vector_store %arg6[%c0_9, %c0_10, %c0_11], %17 {strides = array<i32>} : memref<1x256x128xbf16, #tpu.memory_space<vmem>>, vector<1x256x128xbf16>,
    return
  }
  func.func @transform_0(%arg0: i32, %arg1: i32) -> (i32, i32, i32) {
    %c0_i32 = arith.constant 0 : i32
    %c0_i32_0 = arith.constant 0 : i32
    return %arg0, %arg1, %c0_i32 : i32, i32, i32
  }
  func.func @transform_1(%arg0: i32, %arg1: i32) -> (i32, i32) {
    %c0_i32 = arith.constant 0 : i32
    %c0_i32_0 = arith.constant 0 : i32
    %c0_i32_1 = arith.constant 0 : i32
    return %c0_i32, %c0_i32_0 : i32, i32
  }
  func.func @transform_2(%arg0: i32, %arg1: i32) -> (i32, i32) {
    %c0_i32 = arith.constant 0 : i32
    %c0_i32_0 = arith.constant 0 : i32
    %c0_i32_1 = arith.constant 0 : i32
    return %c0_i32, %c0_i32_0 : i32, i32
  }
  func.func @transform_3(%arg0: i32, %arg1: i32) -> (i32, i32) {
    %c0_i32 = arith.constant 0 : i32
    %c0_i32_0 = arith.constant 0 : i32
    %c0_i32_1 = arith.constant 0 : i32
    return %c0_i32, %c0_i32_0 : i32, i32
  }
  func.func @transform_4(%arg0: i32, %arg1: i32) -> (i32, i32, i32) {
    %c0_i32 = arith.constant 0 : i32
    %c0_i32_0 = arith.constant 0 : i32
    return %arg0, %arg1, %c0_i32 : i32, i32, i32
  }
}

</mosaic_0001>

<bundles_post_ra>
// kernel: tpu_custom_call.1
= control target key start
LH: loop header
LB: loop body
LE: loop exit
PB: predicated region body
PF: predicated region fallthrough
CT: control target
= control target key end

     0   :  { %9 = vsyncpa [#allocation3], 0  ;;  %s2152_s0 = inlined_call_operand.vmem [shape: bf16[2,256,27], index: 0, kind: input, shape index: {}]   ;;  %s2153_s1 = inlined_call_operand.vmem [shape: bf16[27,128], index: 1, kind: input, shape index: {}]   ;;  %s2154_s2 = inlined_call_operand.vmem [shape: f32[1,128], index: 2, kind: input, shape index: {}]   ;;  %s2155_s3 = inlined_call_operand.vmem [shape: f32[1,128], index: 3, kind: input, shape index: {}]   ;;  %s2156_s4 = inlined_call_operand.hbm [shape: bf16[2,256,128], index: 4, kind: output, shape index: {}]  }
   0x1   :  { %11 = vsyncpa [#allocation3 + $0x1], 0  ;;  %s1742_s15 = smov 0   ;;  %s1744_s16 = smov 0  }
   0x2   :  { %s1746_s17 = smov 0   ;;  %s1748_s18 = smov 0  }
   0x3   :  { %s1750_s19 = smov 0   ;;  %s1752_s20 = smov 0  }
   0x4 LB: > { %s1129_s21 = sadd.s32 4294967295, %s1711_s20   ;;  %s1130_s22 = sadd.s32 4294967294, %s1711_s20   ;;  %s1711_s20 = sphi %s1752_s20, %s17_s20   ;;  %s1707_s19 = sphi %s1750_s19, %s2163_s19   ;;  %s1703_s18 = sphi %s1748_s18, %s2162_s18   ;;  %s1699_s17 = sphi %s1746_s17, %s2161_s17   ;;  %s1695_s16 = sphi %s1744_s16, %s2160_s16   ;;  %s1691_s15 = sphi %s1742_s15, %s2159_s15  }
   0x5   : > { %s29_s23 = sadd.s32 1, %s1707_s19  ;;  %s129_s24 = sadd.s32 1, %s1699_s17 }
   0x6   : > { %p31_p0 = scmp.ge.s32.totalorder %s29_s23, 2  ;;  %p139_p1 = scmp.ne.s32.totalorder %s1699_s17, %s1695_s16 }
   0x7   : > { %p140_p2 = scmp.eq.s32.totalorder %s1129_s21, 1  ;;  %p145_p3 = scmp.ne.s32.totalorder %s1695_s16, %s1691_s15 }
   0x8   : > { %s2165_s23 = smov (%p31_p0, %s29_s23), 0  ;;  %p146_p5 = scmp.eq.s32.totalorder %s1130_s22, 1 }
   0x9   : > { %p1782_p4 = por %p140_p2, %p139_p1  ;;  %s124_s26 = ssub.s32 %s1707_s19, %s2165_s23 }
   0xa   : > { %p1133_p6 = scmp.ge.s32.totalorder %s1711_s20, 1  ;;  %p127_p7 = scmp.eq.s32.totalorder %s124_s26, 0 }
   0xb   : > { %p1789_p8 = por %p146_p5, %p145_p3  ;;  %p186_p9 = scmp.lt.s32.totalorder %s1711_s20, 3 }
   0xc   : > { %s1795_s28 = scalar_select %p127_p7, %s1699_s17, %s129_s24  }
   0xd   : > { %p187_p10 = pnand %p1133_p6, %p186_p9 }
   0xe   : > { %v1487_v0 = vld [vmem:[%s2153_s1] sm:$0xff] (!%p187_p10)   ;;  %vm404_vm0 = vcmask (!%p187_p10), 1044480   ;;  %v1488_v1 = vld [vmem:[%s2153_s1 + $0x8] sm:$0x3f] (!%p187_p10)   ;;  %vm405_vm1 = vcmask (!%p187_p10), 1045504   ;;  %p217_p11 = scmp.lt.s32.totalorder (!%p187_p10), %s1703_s18, 1 }
   0xf   : > { %190 = sbr.rel (%p187_p10) target bundleno = 346 (0x15a), region = 36  ;;  %1389 = vmatprep.subr.bf16.mxu0 (!%p187_p10), %v1487_v0  ;;  %1425 = vmatprep.subr.bf16.mxu1 (!%p187_p10), %v1487_v0  ;;  %v1713_v2 = vmov (!%p187_p10), 65535   ;;  %vm355_vm2 = vcmask (!%p187_p10), 220160   ;;  %v1845_v22 = vld [vmem:[%s2154_s2] ss:$0 sm:$0xff] (!%p187_p10)  ;;  %s213_s22 = sand.u32 (!%p187_p10), 1, %s1695_s16  }
  0x10   : > { %1390 = vmatpush3.bf16.msra.mxu0 (!%p187_p10), %v1487_v0  ;;  %1427 = vmatpush3.bf16.msra.mxu1 (!%p187_p10), %v1487_v0  ;;  %v406_v3 = vsel (!%p187_p10), %vm404_vm0, 4294967295, %v1713_v2  ;;  %v1850_v24 = vld [vmem:[%s2155_s3] ss:$0 sm:$0xff] (!%p187_p10)  ;;  %s1977_s24 = sshll.u32 (!%p187_p10), %s213_s22, 7  ;;  %s1275_s29 = sshll.u32 (!%p187_p10), %s1703_s18, 11 }
  0x11   : > { %v407_v4 = vsel (!%p187_p10), %vm405_vm1, %v406_v3, 0  ;;  %s2007_s26 = scalar_lea.vmem (!%p187_p10), [#allocation2], %s1977_s24  ;;  %s1714_s9 = smov (!%p187_p10), [#allocation2]  }
  0x12   : > { %v409_v5 = vand.u32 (!%p187_p10), %v1488_v1, %v407_v4  ;;  %s1050_s30 = sshll.u32 (!%p187_p10), %s2007_s26, 4  ;;  %s1637_s10 = sshll.u32 (!%p187_p10), %s1714_s9, 4  ;;  %s2099_s30 = int_to_ptr.vmem [resolvable:$true] %s1050_s30  ;;  %s1638_s10 = int_to_ptr.vmem [resolvable:$false] %s1637_s10 }
  0x13   : > { %p1640_p1 = scmp.lt.s32.totalorder (!%p187_p10), %s2099_s30, %s1638_s10 }
  0x14   : > { %1391 = vmatprep.subr.bf16.mxu0 (!%p187_p10), %v409_v5  ;;  %1426 = vmatprep.subr.bf16.mxu1 (!%p187_p10), %v409_v5 }
  0x15   : > { %1392 = vmatpush3.bf16.msra.mxu0 (!%p187_p10), %v409_v5  ;;  %1428 = vmatpush3.bf16.msra.mxu1 (!%p187_p10), %v409_v5 }
  0x16   : > { %s218_s7 = scalar_select %p217_p11, %s1703_s18, 1 }
  0x17   : > { %s2097_s18 = scalar_lea.hbm %s2156_s4, %s1275_s29 }
  0x18   : > { %s1242_s8 = sshll.u32 %s218_s7, 7  ;;  %s2106_s7 = scalar_lea.sflag [#allocation3], %s213_s22 }
  0x19   : > { %s1808_s11 = scalar_lea.vmem %s2152_s0, %s1242_s8  ;;  %s1633_s8 = scalar_lea.vmem %s2099_s30, 2048 }
  0x1a   : > { %v1489_v6 = vld [vmem:[%s1808_s11] sm:$0xff]   ;;  %v1491_v8 = vld [vmem:[%s1808_s11 + $0x8] sm:$0xff]   ;;  %v1493_v10 = vld [vmem:[%s1808_s11 + $0x10] sm:$0xff]   ;;  %p1634_p12 = scmp.ne.s32.totalorder %s2099_s30, %s1633_s8 }
  0x1b   : > { %v1490_v7 = vld [vmem:[%s1808_s11 + $0x40] sm:$0xff]   ;;  %1393 = vmatprep.mubr.msk.bf16.mxu0 %vm355_vm2, %v1489_v6  ;;  %v1492_v9 = vld [vmem:[%s1808_s11 + $0x48] sm:$0xff]   ;;  %v1494_v11 = vld [vmem:[%s1808_s11 + $0x50] sm:$0xff]  }
  0x1c   : > { %1409 = vmatprep.mubr.msk.bf16.mxu1 %vm355_vm2, %v1490_v7  ;;  %1394 = vmatmul.mubr.msk.bf16.vlgmr.msra.gmra.mrb[0].mxu0 %vm355_vm2, %v1491_v8  ;;  %v1495_v12 = vld [vmem:[%s1808_s11 + $0x18] sm:$0xff]   ;;  %v1497_v14 = vld [vmem:[%s1808_s11 + $0x20] sm:$0xff]   ;;  %v1499_v16 = vld [vmem:[%s1808_s11 + $0x28] sm:$0xff]   ;;  %p1635_p13 = pnand %p1634_p12, %p1782_p4 }
  0x1d   : > { %1410 = vmatmul.mubr.msk.bf16.vlgmr.msra.gmra.mrb[0].mxu1 %vm355_vm2, %v1492_v9  ;;  %1397 = vmatprep.mubr.msk.bf16.mxu0 %vm355_vm2, %v1493_v10  ;;  %v1496_v13 = vld [vmem:[%s1808_s11 + $0x58] sm:$0xff]   ;;  %v1498_v15 = vld [vmem:[%s1808_s11 + $0x60] sm:$0xff]   ;;  %v1500_v17 = vld [vmem:[%s1808_s11 + $0x68] sm:$0xff]  }
  0x1e   : > { %1413 = vmatprep.mubr.msk.bf16.mxu1 %vm355_vm2, %v1494_v11  ;;  %v1501_v18 = vld [vmem:[%s1808_s11 + $0x30] sm:$0xff]   ;;  %v1503_v20 = vld [vmem:[%s1808_s11 + $0x38] sm:$0xff]   ;;  %p1636_p0 = pneg %p1635_p13 }
  0x1f   : > { %v1502_v19 = vld [vmem:[%s1808_s11 + $0x70] sm:$0xff]   ;;  %v1504_v21 = vld [vmem:[%s1808_s11 + $0x78] sm:$0xff]   ;;  %s1639_s11 = scalar_lea.vmem %s1638_s10, 4096 }
  0x20   : > { %p1641_p2 = scmp.lt.s32.totalorder %s1639_s11, %s1633_s8 }
  0x22   : > { %p1642_p3 = por %p1641_p2, %p1640_p1 }
  0x24   : > { %1398 = vmatmul.mubr.msk.bf16.gmra.mrb[4].mxu0 %vm355_vm2, %v1495_v12  ;;  %p1643_p5 = pnand %p1642_p3, %p1636_p0 }
  0x25   : > { %1414 = vmatmul.mubr.msk.bf16.gmra.mrb[4].mxu1 %vm355_vm2, %v1496_v13  ;;  %1401 = vmatprep.mubr.msk.bf16.mxu0 %vm355_vm2, %v1497_v14 }
  0x26   : > { %1417 = vmatprep.mubr.msk.bf16.mxu1 %vm355_vm2, %v1498_v15 }
  0x2c   : > { %1402 = vmatmul.mubr.msk.bf16.gmra.mrb[8].mxu0 %vm355_vm2, %v1499_v16 }
  0x2d   : > { %1418 = vmatmul.mubr.msk.bf16.gmra.mrb[8].mxu1 %vm355_vm2, %v1500_v17  ;;  %1405 = vmatprep.mubr.msk.bf16.mxu0 %vm355_vm2, %v1501_v18 }
  0x2e   : > { %1421 = vmatprep.mubr.msk.bf16.mxu1 %vm355_vm2, %v1502_v19 }
  0x34   : > { %1406 = vmatmul.mubr.msk.bf16.gmra.mrb[12].mxu0 %vm355_vm2, %v1503_v20 }
  0x35   : > { %1422 = vmatmul.mubr.msk.bf16.gmra.mrb[12].mxu1 %vm355_vm2, %v1504_v21 }
  0xef   : > { %v1395_v23 = vpop.f32.mrb[0].mxu0 }
  0xf0   : > { %v581_v25 = vmul.f32 %v1395_v23, %v1845_v22  ;;  %v1411_v26 = vpop.f32.mrb[0].mxu1  ;;  %v445_v27 = vpop.f32.mrb[1].mxu0 }
  0xf1   : > { %v597_v28 = vmul.f32 %v1411_v26, %v1845_v22  ;;  %v579_v29 = vmul.f32 %v1845_v22, %v445_v27  ;;  %v509_v30 = vpop.f32.mrb[1].mxu1  ;;  %v1396_v31 = vpop.f32.mrb[2].mxu0 }
  0xf2   : > { %v1856_v32 = vadd.f32 %v1850_v24, %v581_v25  ;;  %v595_v33 = vmul.f32 %v1845_v22, %v509_v30  ;;  %v582_v34 = vmul.f32 %v1396_v31, %v1845_v22  ;;  %v1412_v35 = vpop.f32.mrb[2].mxu1  ;;  %v448_v36 = vpop.f32.mrb[3].mxu0 }
  0xf3   : > { %v1861_v37 = vadd.f32 %v1850_v24, %v597_v28  ;;  %v1864_v38 = vadd.f32 %v1850_v24, %v579_v29  ;;  %v598_v39 = vmul.f32 %v1412_v35, %v1845_v22  ;;  %v580_v40 = vmul.f32 %v1845_v22, %v448_v36  ;;  %v512_v41 = vpop.f32.mrb[3].mxu1 }
  0xf4   : > { %v1175_v42 = vmul.f32 -1.442695, %v1856_v32  ;;  %v1870_v43 = vadd.f32 %v1850_v24, %v595_v33  ;;  %v1873_v44 = vadd.f32 %v1850_v24, %v582_v34  ;;  %v596_v45 = vmul.f32 %v1845_v22, %v512_v41 }
  0xf5   : > { %v1191_v46 = vmul.f32 -1.442695, %v1861_v37  ;;  %v1173_v47 = vmul.f32 -1.442695, %v1864_v38  ;;  %v1879_v48 = vadd.f32 %v1850_v24, %v598_v39  ;;  %v1882_v49 = vadd.f32 %v1850_v24, %v580_v40 }
  0xf6   : > { %1505 = vpow2.f32 %v1175_v42  ;;  %v1189_v50 = vmul.f32 -1.442695, %v1870_v43  ;;  %v1176_v51 = vmul.f32 -1.442695, %v1873_v44  ;;  %v1887_v52 = vadd.f32 %v1850_v24, %v596_v45 }
  0xf7   : > { %1507 = vpow2.f32 %v1191_v46  ;;  %v1192_v53 = vmul.f32 -1.442695, %v1879_v48  ;;  %v1399_v54 = vpop.f32.mrb[4].mxu0  ;;  %v1174_v55 = vmul.f32 -1.442695, %v1882_v49 }
  0xf8   : > { %1509 = vpow2.f32 %v1173_v47  ;;  %v585_v56 = vmul.f32 %v1399_v54, %v1845_v22  ;;  %v1415_v57 = vpop.f32.mrb[4].mxu1  ;;  %v461_v58 = vpop.f32.mrb[5].mxu0  ;;  %v1190_v59 = vmul.f32 -1.442695, %v1887_v52 }
  0xf9   : > { %1511 = vpow2.f32 %v1189_v50  ;;  %v601_v60 = vmul.f32 %v1415_v57, %v1845_v22  ;;  %v583_v61 = vmul.f32 %v1845_v22, %v461_v58  ;;  %v525_v62 = vpop.f32.mrb[5].mxu1  ;;  %v1400_v63 = vpop.f32.mrb[6].mxu0 }
  0xfa   : > { %1513 = vpow2.f32 %v1176_v51  ;;  %v1896_v0 = vadd.f32 %v1850_v24, %v585_v56  ;;  %v599_v1 = vmul.f32 %v1845_v22, %v525_v62  ;;  %v586_v2 = vmul.f32 %v1400_v63, %v1845_v22  ;;  %v1416_v3 = vpop.f32.mrb[6].mxu1  ;;  %v464_v4 = vpop.f32.mrb[7].mxu0 }
  0xfb   : > { %1515 = vpow2.f32 %v1192_v53  ;;  %v1901_v5 = vadd.f32 %v1850_v24, %v601_v60  ;;  %v1904_v6 = vadd.f32 %v1850_v24, %v583_v61  ;;  %v528_v7 = vpop.f32.mrb[7].mxu1  ;;  %v602_v13 = vmul.f32 %v1416_v3, %v1845_v22 }
  0xfc   : > { %1517 = vpow2.f32 %v1174_v55  ;;  %v1179_v8 = vmul.f32 -1.442695, %v1896_v0  ;;  %v1908_v9 = vadd.f32 %v1850_v24, %v599_v1  ;;  %v1911_v10 = vadd.f32 %v1850_v24, %v586_v2 }
  0xfd   : > { %1519 = vpow2.f32 %v1190_v59  ;;  %v1195_v11 = vmul.f32 -1.442695, %v1901_v5  ;;  %v1177_v12 = vmul.f32 -1.442695, %v1904_v6  ;;  %v1919_v23 = vadd.f32 %v1850_v24, %v602_v13 }
  0xfe   : > { %1521 = vpow2.f32 %v1179_v8  ;;  %v1193_v14 = vmul.f32 -1.442695, %v1908_v9  ;;  %v1180_v15 = vmul.f32 -1.442695, %v1911_v10  ;;  %v584_v25 = vmul.f32 %v1845_v22, %v464_v4 }
  0xff   : > { %1523 = vpow2.f32 %v1195_v11  ;;  %v1403_v16 = vpop.f32.mrb[8].mxu0  ;;  %v600_v30 = vmul.f32 %v1845_v22, %v528_v7  ;;  %v1196_v45 = vmul.f32 -1.442695, %v1919_v23 }
 0x100   : > { %v1506_v17 = vpop.eup %1505  ;;  %1525 = vpow2.f32 %v1177_v12  ;;  %v1419_v18 = vpop.f32.mrb[8].mxu1  ;;  %v1925_v46 = vadd.f32 %v1850_v24, %v584_v25  ;;  %v589_v53 = vmul.f32 %v1403_v16, %v1845_v22 }
 0x101   : > { %v477_v19 = vpop.f32.mrb[9].mxu0  ;;  %v1508_v20 = vpop.eup %1507  ;;  %v748_v21 = vadd.f32 1.0, %v1506_v17  ;;  %1527 = vpow2.f32 %v1193_v14  ;;  %v1928_v51 = vadd.f32 %v1850_v24, %v600_v30  ;;  %v605_v56 = vmul.f32 %v1419_v18, %v1845_v22 }
 0x102   : > { %v541_v26 = vpop.f32.mrb[9].mxu1  ;;  %v1404_v27 = vpop.f32.mrb[10].mxu0  ;;  %v764_v29 = vadd.f32 1.0, %v1508_v20  ;;  %1529 = vpow2.f32 %v1180_v15  ;;  %v587_v57 = vmul.f32 %v1845_v22, %v477_v19  ;;  %v1178_v4 = vmul.f32 -1.442695, %v1925_v46 }
 0x103   : > { %v1510_v28 = vpop.eup %1509  ;;  %v1420_v31 = vpop.f32.mrb[10].mxu1  ;;  %1531 = vrcp.f32 %v748_v21  ;;  %v603_v61 = vmul.f32 %v1845_v22, %v541_v26  ;;  %v590_v62 = vmul.f32 %v1404_v27, %v1845_v22  ;;  %v1944_v14 = vadd.f32 %v1850_v24, %v589_v53 }
 0x104   : > { %v480_v33 = vpop.f32.mrb[11].mxu0  ;;  %v1512_v34 = vpop.eup %1511  ;;  %v746_v35 = vadd.f32 1.0, %v1510_v28  ;;  %1533 = vrcp.f32 %v764_v29  ;;  %v606_v7 = vmul.f32 %v1420_v31, %v1845_v22  ;;  %v1952_v20 = vadd.f32 %v1850_v24, %v605_v56 }
 0x105   : > { %v544_v36 = vpop.f32.mrb[11].mxu1  ;;  %v1514_v39 = vpop.eup %1513  ;;  %v762_v40 = vadd.f32 1.0, %v1512_v34  ;;  %v588_v15 = vmul.f32 %v1845_v22, %v480_v33  ;;  %v1955_v21 = vadd.f32 %v1850_v24, %v587_v57  ;;  %v1961_v28 = vadd.f32 %v1850_v24, %v603_v61 }
 0x106   : > { %v1516_v41 = vpop.eup %1515  ;;  %1535 = vrcp.f32 %v746_v35  ;;  %v749_v42 = vadd.f32 1.0, %v1514_v39  ;;  %v1964_v29 = vadd.f32 %v1850_v24, %v590_v62  ;;  %v1967_v33 = vadd.f32 %v1850_v24, %v606_v7 }
 0x107   : > { %v1518_v47 = vpop.eup %1517  ;;  %1537 = vrcp.f32 %v762_v40  ;;  %v765_v50 = vadd.f32 1.0, %v1516_v41  ;;  %v1407_v58 = vpop.f32.mrb[12].mxu0  ;;  %v604_v34 = vmul.f32 %v1845_v22, %v544_v36  ;;  %v1194_v39 = vmul.f32 -1.442695, %v1928_v51 }
 0x108   : > { %v1520_v54 = vpop.eup %1519  ;;  %1539 = vrcp.f32 %v749_v42  ;;  %v747_v55 = vadd.f32 1.0, %v1518_v47  ;;  %v1423_v63 = vpop.f32.mrb[12].mxu1  ;;  %v1972_v40 = vadd.f32 %v1850_v24, %v588_v15  ;;  %v593_v41 = vmul.f32 %v1407_v58, %v1845_v22 }
 0x109   : > { %v1522_v59 = vpop.eup %1521  ;;  %1541 = vrcp.f32 %v765_v50  ;;  %v763_v60 = vadd.f32 1.0, %v1520_v54  ;;  %v1935_v1 = vpop.f32.mrb[13].mxu0  ;;  %v1183_v47 = vmul.f32 -1.442695, %v1944_v14  ;;  %v1199_v50 = vmul.f32 -1.442695, %v1952_v20 }
 0x10a   : > { %v1524_v2 = vpop.eup %1523  ;;  %1543 = vrcp.f32 %v747_v55  ;;  %v752_v3 = vadd.f32 1.0, %v1522_v59  ;;  %v1939_v8 = vpop.f32.mrb[13].mxu1  ;;  %v609_v36 = vmul.f32 %v1423_v63, %v1845_v22  ;;  %v1181_v54 = vmul.f32 -1.442695, %v1955_v21 }
 0x10b   : > { %v1941_v11 = vpop.f32.mrb[14].mxu0  ;;  %v1526_v12 = vpop.eup %1525  ;;  %1545 = vrcp.f32 %v763_v60  ;;  %v768_v13 = vadd.f32 1.0, %v1524_v2  ;;  %v1197_v55 = vmul.f32 -1.442695, %v1961_v28  ;;  %v1184_v56 = vmul.f32 -1.442695, %v1964_v29 }
 0x10c   : > { %v1947_v16 = vpop.f32.mrb[14].mxu1  ;;  %v1949_v17 = vpop.f32.mrb[15].mxu0  ;;  %1547 = vrcp.f32 %v752_v3  ;;  %v750_v19 = vadd.f32 1.0, %v1526_v12  ;;  %v1200_v59 = vmul.f32 -1.442695, %v1967_v33  ;;  %v1988_v60 = vadd.f32 %v1850_v24, %v604_v34 }
 0x10d   : > { %v1528_v18 = vpop.eup %1527  ;;  %v1957_v25 = vpop.f32.mrb[15].mxu1  ;;  %1549 = vrcp.f32 %v768_v13  ;;  %v1993_v63 = vadd.f32 %v1850_v24, %v593_v41 }
 0x10e   : > { %v1530_v26 = vpop.eup %1529  ;;  %v766_v27 = vadd.f32 1.0, %v1528_v18  ;;  %1551 = vrcp.f32 %v750_v19 }
 0x10f   : > { %v1532_v30 = vpop.eup %1531  ;;  %v753_v31 = vadd.f32 1.0, %v1530_v26 }
 0x110   : > { %v1534_v35 = vpop.eup %1533  ;;  %1553 = vrcp.f32 %v766_v27  ;;  %v844_v58 = vmul.f32 %v1532_v30, %v1856_v32 }
 0x111   : > { %v1536_v42 = vpop.eup %1535  ;;  %1555 = vrcp.f32 %v753_v31  ;;  %v860_v3 = vmul.f32 %v1534_v35, %v1861_v37 }
 0x112   : > { %v1538_v53 = vpop.eup %1537  ;;  %1557 = vpow2.f32 %v1196_v45  ;;  %v1182_v45 = vmul.f32 -1.442695, %v1972_v40  ;;  %v842_v12 = vmul.f32 %v1536_v42, %v1864_v38 }
 0x113   : > { %v1540_v57 = vpop.eup %1539  ;;  %1559 = vpow2.f32 %v1178_v4  ;;  %v1998_v4 = vadd.f32 %v1850_v24, %v609_v36  ;;  %v858_v18 = vmul.f32 %v1538_v53, %v1870_v43 }
 0x114   : > { %v1542_v61 = vpop.eup %1541  ;;  %v845_v62 = vmul.f32 %v1540_v57, %v1873_v44  ;;  %1561 = vpow2.f32 %v1194_v39 }
 0x115   : > { %v1544_v2 = vpop.eup %1543  ;;  %v861_v32 = vmul.f32 %v1542_v61, %v1879_v48  ;;  %1563 = vpow2.f32 %v1183_v47  ;;  %v1198_v48 = vmul.f32 -1.442695, %v1988_v60  ;;  %v1203_v30 = vmul.f32 -1.442695, %v1998_v4 }
 0x116   : > { %v1546_v7 = vpop.eup %1545  ;;  %v1284_v44 = vpack.c.bf16 %v845_v62, %v844_v58  ;;  %v843_v13 = vmul.f32 %v1544_v2, %v1882_v49  ;;  %1565 = vpow2.f32 %v1199_v50  ;;  %v607_v58 = vmul.f32 %v1845_v22, %v1939_v8 }
 0x117   : > { %v1548_v15 = vpop.eup %1547  ;;  %v1324_v19 = vpack.c.bf16 %v861_v32, %v860_v3  ;;  %v859_v26 = vmul.f32 %v1546_v7, %v1887_v52  ;;  %1567 = vpow2.f32 %v1181_v54  ;;  %v1187_v52 = vmul.f32 -1.442695, %v1993_v63 }
 0x118   : > { %v2004_v37 = vpop.eup %1549  ;;  %1356 = vst [vmem:[%s2007_s26 + $0x8] sm:$0xff] %v1284_v44   ;;  %v1279_v38 = vpack.c.bf16 %v843_v13, %v842_v12  ;;  %1569 = vpow2.f32 %v1197_v55  ;;  %v848_v35 = vmul.f32 %v1548_v15, %v1896_v0  ;;  %v591_v0 = vmul.f32 %v1845_v22, %v1935_v1 }
 0x119   : > { %v2011_v49 = vpop.eup %1551  ;;  %1364 = vst [vmem:[%s2007_s26 + $0x48] sm:$0xff] %v1324_v19   ;;  %v1319_v43 = vpack.c.bf16 %v859_v26, %v858_v18  ;;  %1571 = vpow2.f32 %v1184_v56  ;;  %v594_v62 = vmul.f32 %v1941_v11, %v1845_v22  ;;  %v610_v3 = vmul.f32 %v1947_v16, %v1845_v22 }
 0x11a   : > { %v2015_v27 = vpop.eup %1553  ;;  %1280 = vst [vmem:[%s2007_s26] sm:$0xff] %v1279_v38   ;;  %1573 = vpow2.f32 %v1200_v59  ;;  %v2032_v7 = vadd.f32 %v1850_v24, %v591_v0  ;;  %v592_v8 = vmul.f32 %v1845_v22, %v1949_v17  ;;  %v2037_v11 = vadd.f32 %v1850_v24, %v607_v58 }
 0x11b   : > { %v1556_v31 = vpop.eup %1555  ;;  %1363 = vst [vmem:[%s2007_s26 + $0x40] sm:$0xff] %v1319_v43   ;;  %1575 = vpow2.f32 %v1182_v45  ;;  %v608_v13 = vmul.f32 %v1845_v22, %v1957_v25  ;;  %v2042_v18 = vadd.f32 %v1850_v24, %v594_v62  ;;  %v2045_v17 = vadd.f32 %v1850_v24, %v610_v3 }
 0x11c   : > { %v1558_v34 = vpop.eup %1557  ;;  %v849_v39 = vmul.f32 %v1556_v31, %v1911_v10  ;;  %1577 = vpow2.f32 %v1198_v48  ;;  %v1185_v48 = vmul.f32 -1.442695, %v2032_v7  ;;  %v2049_v43 = vadd.f32 %v1850_v24, %v592_v8 }
 0x11d   : > { %v1560_v41 = vpop.eup %1559  ;;  %v769_v42 = vadd.f32 1.0, %v1558_v34  ;;  %1579 = vpow2.f32 %v1187_v52  ;;  %v1201_v25 = vmul.f32 -1.442695, %v2037_v11  ;;  %v2053_v52 = vadd.f32 %v1850_v24, %v608_v13 }
 0x11e   : > { %v1562_v47 = vpop.eup %1561  ;;  %v1294_v50 = vpack.c.bf16 %v849_v39, %v848_v35  ;;  %v751_v36 = vadd.f32 1.0, %v1560_v41  ;;  %1581 = vpow2.f32 %v1203_v30  ;;  %v864_v31 = vmul.f32 %v2004_v37, %v1901_v5 }
 0x11f   : > { %v1564_v53 = vpop.eup %1563  ;;  %1583 = vrcp.f32 %v769_v42  ;;  %v767_v54 = vadd.f32 1.0, %v1562_v47  ;;  %v1188_v35 = vmul.f32 -1.442695, %v2042_v18  ;;  %v846_v41 = vmul.f32 %v2011_v49, %v1904_v6 }
 0x120   : > { %v1566_v55 = vpop.eup %1565  ;;  %1358 = vst [vmem:[%s2007_s26 + $0x18] sm:$0xff] %v1294_v50   ;;  %1585 = vrcp.f32 %v751_v36  ;;  %v756_v56 = vadd.f32 1.0, %v1564_v53  ;;  %v862_v42 = vmul.f32 %v2015_v27, %v1908_v9  ;;  %v1204_v24 = vmul.f32 -1.442695, %v2045_v17 }
 0x121   : > { %v1568_v57 = vpop.eup %1567  ;;  %1587 = vrcp.f32 %v767_v54  ;;  %v772_v10 = vadd.f32 1.0, %v1566_v55  ;;  %v1202_v6 = vmul.f32 -1.442695, %v2053_v52 }
 0x122   : > { %v1570_v59 = vpop.eup %1569  ;;  %1589 = vrcp.f32 %v756_v56  ;;  %v754_v61 = vadd.f32 1.0, %v1568_v57 }
 0x123   : > { %v1572_v45 = vpop.eup %1571  ;;  %1591 = vrcp.f32 %v772_v10  ;;  %v770_v2 = vadd.f32 1.0, %v1570_v59 }
 0x124   : > { %v1574_v32 = vpop.eup %1573  ;;  %1593 = vrcp.f32 %v754_v61  ;;  %v757_v1 = vadd.f32 1.0, %v1572_v45 }
 0x125   : > { %v1576_v12 = vpop.eup %1575  ;;  %1595 = vrcp.f32 %v770_v2  ;;  %v773_v44 = vadd.f32 1.0, %v1574_v32 }
 0x126   : > { %v1578_v15 = vpop.eup %1577  ;;  %1597 = vrcp.f32 %v757_v1  ;;  %v755_v16 = vadd.f32 1.0, %v1576_v12 }
 0x127   : > { %v1580_v19 = vpop.eup %1579  ;;  %1599 = vrcp.f32 %v773_v44  ;;  %v771_v26 = vadd.f32 1.0, %v1578_v15 }
 0x128   : > { %v1582_v38 = vpop.eup %1581  ;;  %1601 = vrcp.f32 %v755_v16  ;;  %v760_v62 = vadd.f32 1.0, %v1580_v19 }
 0x129   : > { %v1584_v22 = vpop.eup %1583  ;;  %1603 = vrcp.f32 %v771_v26  ;;  %v776_v2 = vadd.f32 1.0, %v1582_v38 }
 0x12a   : > { %v1586_v30 = vpop.eup %1585  ;;  %v865_v34 = vmul.f32 %v1584_v22, %v1919_v23  ;;  %1605 = vpow2.f32 %v1185_v48  ;;  %v1186_v23 = vmul.f32 -1.442695, %v2049_v43 }
 0x12b   : > { %v1588_v39 = vpop.eup %1587  ;;  %v847_v47 = vmul.f32 %v1586_v30, %v1925_v46  ;;  %1607 = vpow2.f32 %v1201_v25 }
 0x12c   : > { %v1590_v50 = vpop.eup %1589  ;;  %v1334_v36 = vpack.c.bf16 %v865_v34, %v864_v31  ;;  %v863_v5 = vmul.f32 %v1588_v39, %v1928_v51  ;;  %1609 = vpow2.f32 %v1188_v35 }
 0x12d   : > { %v1592_v37 = vpop.eup %1591  ;;  %v1289_v53 = vpack.c.bf16 %v847_v47, %v846_v41  ;;  %1611 = vpow2.f32 %v1204_v24  ;;  %v852_v51 = vmul.f32 %v1590_v50, %v1944_v14 }
 0x12e   : > { %v1594_v49 = vpop.eup %1593  ;;  %1366 = vst [vmem:[%s2007_s26 + $0x58] sm:$0xff] %v1334_v36   ;;  %v1329_v9 = vpack.c.bf16 %v863_v5, %v862_v42  ;;  %1613 = vpow2.f32 %v1186_v23  ;;  %v868_v0 = vmul.f32 %v1592_v37, %v1952_v20 }
 0x12f   : > { %v1596_v46 = vpop.eup %1595  ;;  %1357 = vst [vmem:[%s2007_s26 + $0x10] sm:$0xff] %v1289_v53   ;;  %1615 = vpow2.f32 %v1202_v6  ;;  %v850_v58 = vmul.f32 %v1594_v49, %v1955_v21 }
 0x130   : > { %v1598_v27 = vpop.eup %1597  ;;  %1365 = vst [vmem:[%s2007_s26 + $0x50] sm:$0xff] %v1329_v9   ;;  %v866_v14 = vmul.f32 %v1596_v46, %v1961_v28  ;;  %1617 = vrcp.f32 %v760_v62 }
 0x131   : > { %v1600_v54 = vpop.eup %1599  ;;  %v853_v55 = vmul.f32 %v1598_v27, %v1964_v29  ;;  %1619 = vrcp.f32 %v776_v2 }
 0x132   : > { %v1602_v56 = vpop.eup %1601  ;;  %v869_v57 = vmul.f32 %v1600_v54, %v1967_v33 }
 0x133   : > { %v1604_v10 = vpop.eup %1603  ;;  %v1304_v59 = vpack.c.bf16 %v853_v55, %v852_v51  ;;  %v851_v61 = vmul.f32 %v1602_v56, %v1972_v40 }
 0x134   : > { %v1344_v45 = vpack.c.bf16 %v869_v57, %v868_v0  ;;  %v867_v29 = vmul.f32 %v1604_v10, %v1988_v60  ;;  %v1606_v20 = vpop.eup %1605 }
 0x135   : > { %1360 = vst [vmem:[%s2007_s26 + $0x28] sm:$0xff] %v1304_v59   ;;  %v1299_v3 = vpack.c.bf16 %v851_v61, %v850_v58  ;;  %v1608_v32 = vpop.eup %1607  ;;  %v758_v21 = vadd.f32 1.0, %v1606_v20 }
 0x136   : > { %1368 = vst [vmem:[%s2007_s26 + $0x68] sm:$0xff] %v1344_v45   ;;  %v1339_v33 = vpack.c.bf16 %v867_v29, %v866_v14  ;;  %v1610_v1 = vpop.eup %1609  ;;  %v774_v40 = vadd.f32 1.0, %v1608_v32 }
 0x137   : > { %1359 = vst [vmem:[%s2007_s26 + $0x20] sm:$0xff] %v1299_v3   ;;  %v1612_v8 = vpop.eup %1611  ;;  %1621 = vrcp.f32 %v758_v21  ;;  %v761_v28 = vadd.f32 1.0, %v1610_v1 }
 0x138   : > { %1367 = vst [vmem:[%s2007_s26 + $0x60] sm:$0xff] %v1339_v33   ;;  %v1614_v12 = vpop.eup %1613  ;;  %1623 = vrcp.f32 %v774_v40  ;;  %v777_v60 = vadd.f32 1.0, %v1612_v8 }
 0x139   : > { %v1616_v44 = vpop.eup %1615  ;;  %1625 = vrcp.f32 %v761_v28  ;;  %v759_v13 = vadd.f32 1.0, %v1614_v12 }
 0x13a   : > { %1627 = vrcp.f32 %v777_v60  ;;  %v775_v15 = vadd.f32 1.0, %v1616_v44  ;;  %v1618_v16 = vpop.eup %1617 }
 0x13b   : > { %1629 = vrcp.f32 %v759_v13  ;;  %v1620_v19 = vpop.eup %1619  ;;  %v856_v25 = vmul.f32 %v1618_v16, %v1993_v63 }
 0x13c   : > { %1631 = vrcp.f32 %v775_v15  ;;  %v872_v34 = vmul.f32 %v1620_v19, %v1998_v4 }
 0x141   : > { %v1622_v26 = vpop.eup %1621 }
 0x142   : > { %v1624_v38 = vpop.eup %1623  ;;  %v854_v41 = vmul.f32 %v1622_v26, %v2032_v7 }
 0x143   : > { %v1626_v48 = vpop.eup %1625 }
 0x144   : > { %v1628_v22 = vpop.eup %1627  ;;  %v857_v30 = vmul.f32 %v1626_v48, %v2042_v18  ;;  %v870_v18 = vmul.f32 %v1624_v38, %v2037_v11 }
 0x145   : > { %v1630_v31 = vpop.eup %1629  ;;  %v873_v35 = vmul.f32 %v1628_v22, %v2045_v17 }
 0x146   : > { %v1632_v39 = vpop.eup %1631  ;;  %v1314_v42 = vpack.c.bf16 %v857_v30, %v856_v25  ;;  %v855_v63 = vmul.f32 %v1630_v31, %v2049_v43 }
 0x147   : > { %v1354_v47 = vpack.c.bf16 %v873_v35, %v872_v34  ;;  %v871_v24 = vmul.f32 %v1632_v39, %v2053_v52 }
 0x148   : > { %1362 = vst [vmem:[%s2007_s26 + $0x38] sm:$0xff] %v1314_v42   ;;  %v1309_v4 = vpack.c.bf16 %v855_v63, %v854_v41 }
 0x149   : > { %1370 = vst [vmem:[%s2007_s26 + $0x78] sm:$0xff] %v1354_v47   ;;  %v1349_v7 = vpack.c.bf16 %v871_v24, %v870_v18 }
 0x14a   : > { %1361 = vst [vmem:[%s2007_s26 + $0x30] sm:$0xff] %v1309_v4  }
 0x14b   : > { %1369 = vst [vmem:[%s2007_s26 + $0x70] sm:$0xff] %v1349_v7  }
 0x14c   : > { %1646 = shalt.err (!%p1643_p5)
}
 0x14d   : > { %s1647_s12 = scalar_lea.hbm %s2097_s18, 2048  ;;  %s1651_s21 = scalar_lea.hbm %s2156_s4, 4096 }
 0x14e   : > { %p1648_p6 = scmp.ne.s32.totalorder %s2097_s18, %s1647_s12  ;;  %p1652_p10 = scmp.lt.u32.totalorder %s2097_s18, %s2156_s4 }
 0x14f   : > { %p1653_p11 = scmp.lt.u32.totalorder %s1651_s21, %s1647_s12  ;;  %p1655_p13 = scmp.lt.u32.totalorder %s1647_s12, %s2097_s18 }
 0x150   : > { %p1649_p7 = pnand %p1648_p6, %p1782_p4 }
 0x151   : > { %p1654_p12 = por %p1653_p11, %p1652_p10 }
 0x152   : > { %p1650_p9 = pneg %p1649_p7 }
 0x153   : > { %p1656_p0 = por %p1655_p13, %p1654_p12 }
 0x155   : > { %p1657_p1 = pnand %p1656_p0, %p1650_p9 }
 0x157   : > { %1660 = shalt.err (!%p1657_p1)
}
 0x158   : > { %s1715_s26 = smov 64   ;;  %s1716_s29 = smov 4  }
 0x159   : > { %1429 = dma.vmem_to_hbm [thread:$0]  (%p1782_p4), %s2099_s30, 2048, %s2097_s18, %s2106_s7, %s1715_s26, %s1715_s26, %s1716_s29  }
 0x15a PF: > { %p1435_p2 = scmp.ge.s32.totalorder %s1711_s20, 2  ;;  %s1065_s5 = sand.u32 1, %s1691_s15  }
 0x15b   : > { %s1066_s6 = scalar_lea.sflag [#allocation3], %s1065_s5 }
 0x15c   : > { %p1432_p3 = pnand %p1435_p2, %p1789_p8 }
 0x15e   : > { %1686 = dma.done.wait (!%p1432_p3), %s1066_s6, 2048  }
 0x15f   : > { %1688 = vsyncadd (!%p1432_p3), %s1066_s6, 4294965248  ;;  %s17_s20 = sadd.s32 1, %s1711_s20   ;;  %s2159_s15 = smov %s1695_s16 }
 0x160   : > { %p14_p5 = scmp.ge.s32.totalorder %s17_s20, 4   ;;  %s2160_s16 = smov %s1699_s17 }
 0x161   : > { %s2161_s17 = smov %s1795_s28  ;;  %s2162_s18 = smov %s1707_s19 }
 0x162   : > { %s2163_s19 = smov %s2165_s23  ;;  %16 = sbr.rel (!%p14_p5) target bundleno = 4 (0x4), region = 71 }
 0x169   :  { %1071 = vsyncpa [#allocation3], 1 }
 0x16a   :  { %1073 = vsyncpa [#allocation3 + $0x1], 1 }

</bundles_post_ra>
